<compile_context>
chip_gen: v6e
topology: v6e:2x2x1
jax: 0.10.0
libtpu: 0.0.40
codegen_flags: <defaults>
</compile_context>

<pallas_src>
import functools

import jax
import jax.numpy as jnp
import numpy as np
from jax.experimental import pallas as pl
from jax.experimental.pallas import tpu as pltpu


def _round_up(n, m):
    return ((n + m - 1) // m) * m


def mlp_kernel(x_ref, w1_ref, b1_ref, w2_ref, b2_ref, o_ref):
    # x_ref: (obs, TB)   w1_ref: (Hpad, obs)   b1_ref: (Hpad, 1)
    # w2_ref: (A, Hpad)  b2_ref: (A, 1)        o_ref: (A, TB)
    x = x_ref[...]
    h = jnp.dot(w1_ref[...], x, preferred_element_type=jnp.float32)   # (Hpad, TB) on MXU
    h = jnp.maximum(h + b1_ref[...], 0.0)                             # bias + ReLU on VPU (f32)
    o = jnp.dot(w2_ref[...], h, preferred_element_type=jnp.float32)   # (A, TB), K=128 contraction
    o_ref[...] = (o + b2_ref[...]).astype(o_ref.dtype)


@functools.partial(jax.jit, static_argnames=("block_b",))
def net_forward(x, w1_t, b1, w2_t, b2, *, block_b=8192):
    """x: (B, obs) f32. Params in kernel layout (see pack_params).

    Returns logits (B, A) f32.
    """
    B, obs = x.shape
    hidden_pad = w1_t.shape[0]
    n_actions = w2_t.shape[0]

    # --- batch tiling: tight padding, >=2 tiles for megacore when B is large ---
    n_tiles = pl.cdiv(B, block_b)
    if B >= 256:
        n_tiles = max(n_tiles, 2)            # shard across both TCs on v7x
    if n_tiles == 1:
        tb = B                               # full-extent block: no padding at all
    else:
        tb = _round_up(pl.cdiv(B, n_tiles), 128)   # lane-aligned tile
    b_pad = tb * n_tiles

    # Batch-on-lanes layout.
    x_t = x.T                                # (obs, B)
    if b_pad != B:
        x_t = jnp.pad(x_t, ((0, 0), (0, b_pad - B)))

    cost = pl.CostEstimate(
        flops=2 * b_pad * (obs * hidden_pad + hidden_pad * n_actions),
        transcendentals=0,
        bytes_accessed=4 * (b_pad * obs + w1_t.size + b1.size + w2_t.size + b2.size
                            + b_pad * n_actions),
    )

    out_t = pl.pallas_call(
        mlp_kernel,
        out_shape=jax.ShapeDtypeStruct((n_actions, b_pad), jnp.float32),
        grid=(n_tiles,),
        in_specs=[
            pl.BlockSpec((obs, tb), lambda i: (0, i)),          # x^T tiled over batch lanes
            pl.BlockSpec(w1_t.shape, lambda i: (0, 0)),         # weights VMEM-resident
            pl.BlockSpec(b1.shape, lambda i: (0, 0)),
            pl.BlockSpec(w2_t.shape, lambda i: (0, 0)),
            pl.BlockSpec(b2.shape, lambda i: (0, 0)),
        ],
        out_specs=pl.BlockSpec((n_actions, tb), lambda i: (0, i)),   # lane-dense stores
        compiler_params=pltpu.CompilerParams(
            dimension_semantics=("parallel",),                  # megacore on v7x
        ),
        cost_estimate=cost,
    )(x_t, w1_t, b1, w2_t, b2)

    return out_t[:, :B].T                                       # (B, A)


def init_params_pt(key, obs_size, hidden_size, n_actions):
    """Deterministic PyTorch-style init: U(-1/sqrt(fan_in), 1/sqrt(fan_in)).

    Returns params in PyTorch Linear layout: w (out, in), b (out,).
    """
    k1, k2, k3, k4 = jax.random.split(key, 4)
    bound1 = 1.0 / np.sqrt(obs_size)
    bound2 = 1.0 / np.sqrt(hidden_size)
    w1_pt = jax.random.uniform(k1, (hidden_size, obs_size), jnp.float32, -bound1, bound1)
    b1_pt = jax.random.uniform(k2, (hidden_size,), jnp.float32, -bound1, bound1)
    w2_pt = jax.random.uniform(k3, (n_actions, hidden_size), jnp.float32, -bound2, bound2)
    b2_pt = jax.random.uniform(k4, (n_actions,), jnp.float32, -bound2, bound2)
    return w1_pt, b1_pt, w2_pt, b2_pt


def pack_params(w1_pt, b1_pt, w2_pt, b2_pt):
    """PyTorch layout -> kernel (transposed, batch-on-lanes) layout.

    w1_t: (Hpad, obs), b1: (Hpad, 1), w2_t: (A, Hpad), b2: (A, 1), with the
    hidden dim zero-padded to a multiple of 128.  Padding is inert: padded
    hidden rows give ReLU(0 + 0) = 0 and the matching zero columns of w2_t
    contribute nothing to the output.
    """
    hidden, _obs = w1_pt.shape
    n_actions = w2_pt.shape[0]
    hidden_pad = _round_up(hidden, 128)
    dh = hidden_pad - hidden

    w1_t = jnp.pad(w1_pt, ((0, dh), (0, 0)))                    # (Hpad, obs)
    b1 = jnp.pad(b1_pt, ((0, dh),)).reshape(hidden_pad, 1)      # (Hpad, 1)
    w2_t = jnp.pad(w2_pt, ((0, 0), (0, dh)))                    # (A, Hpad)
    b2 = b2_pt.reshape(n_actions, 1)                            # (A, 1)
    return w1_t, b1, w2_t, b2


if __name__ == "__main__":
    # CartPole-ish small shapes: obs=4, hidden=32, n_actions=2.
    obs_size, hidden_size, n_actions, batch = 4, 32, 2, 8

    key = jax.random.PRNGKey(0)
    kx, kp, kx2 = jax.random.split(key, 3)

    w1_pt, b1_pt, w2_pt, b2_pt = init_params_pt(kp, obs_size, hidden_size, n_actions)
    w1_t, b1, w2_t, b2 = pack_params(w1_pt, b1_pt, w2_pt, b2_pt)

    def ref_forward(xv):
        return jnp.maximum(xv @ w1_pt.T + b1_pt, 0.0) @ w2_pt.T + b2_pt

    # 1) Tiny CartPole batch (single tile, no padding).
    x = jax.random.normal(kx, (batch, obs_size), jnp.float32)
    logits = net_forward(x, w1_t, b1, w2_t, b2)
    jax.block_until_ready(logits)
    np.testing.assert_allclose(np.asarray(logits), np.asarray(ref_forward(x)),
                               rtol=1e-5, atol=1e-5)

    # 2) Larger batch exercising the multi-tile / megacore grid path (+ batch padding).
    xb = jax.random.normal(kx2, (300, obs_size), jnp.float32)
    logits_b = net_forward(xb, w1_t, b1, w2_t, b2, block_b=128)
    jax.block_until_ready(logits_b)
    np.testing.assert_allclose(np.asarray(logits_b), np.asarray(ref_forward(xb)),
                               rtol=1e-5, atol=1e-5)

    print("KERNEL_OK")
</pallas_src>

<mosaic_0001>
module attributes {stable_mosaic.version = 11 : i64} {
  func.func @mlp_kernel(%arg0: i32, %arg1: memref<4x8xf32, #tpu.memory_space<vmem>>, %arg2: memref<128x4xf32, #tpu.memory_space<vmem>>, %arg3: memref<128x1xf32, #tpu.memory_space<vmem>>, %arg4: memref<2x128xf32, #tpu.memory_space<vmem>>, %arg5: memref<2x1xf32, #tpu.memory_space<vmem>>, %arg6: memref<2x8xf32, #tpu.memory_space<vmem>>) attributes {dimension_semantics = [#tpu.dimension_semantics<parallel>], iteration_bounds = array<i64: 1>, scalar_prefetch = 0 : i64, scratch_operands = 0 : i64, tpu.core_type = #tpu.core_type<tc>, window_params = [{transform_indices = @transform_0, window_bounds = array<i64: 4, 8>}, {pipeline_mode = #tpu.pipeline_mode<synchronous>, transform_indices = @transform_1, window_bounds = array<i64: 128, 4>}, {pipeline_mode = #tpu.pipeline_mode<synchronous>, transform_indices = @transform_2, window_bounds = array<i64: 128, 1>}, {pipeline_mode = #tpu.pipeline_mode<synchronous>, transform_indices = @transform_3, window_bounds = array<i64: 2, 128>}, {pipeline_mode = #tpu.pipeline_mode<synchronous>, transform_indices = @transform_4, window_bounds = array<i64: 2, 1>}, {transform_indices = @transform_5, window_bounds = array<i64: 2, 8>}]} {
    %c0 = arith.constant 0 : index
    %c0_0 = arith.constant 0 : index
    %0 = vector.load %arg1[%c0, %c0_0] : memref<4x8xf32, #tpu.memory_space<vmem>>, vector<4x8xf32>
    %c0_1 = arith.constant 0 : index
    %c0_2 = arith.constant 0 : index
    %1 = vector.load %arg2[%c0_1, %c0_2] : memref<128x4xf32, #tpu.memory_space<vmem>>, vector<128x4xf32>
    %cst = arith.constant dense<0.000000e+00> : vector<128x8xf32>
    %2 = tpu.matmul %1, %0, %cst {dimension_numbers = #tpu.dot_dimension_numbers<[1], [0], [0], [1], [0, 0, 1, 1], [], []>} : vector<128x4xf32>, vector<4x8xf32>, vector<128x8xf32> -> vector<128x8xf32>
    %c0_3 = arith.constant 0 : index
    %c0_4 = arith.constant 0 : index
    %3 = vector.load %arg3[%c0_3, %c0_4] : memref<128x1xf32, #tpu.memory_space<vmem>>, vector<128x1xf32>
    %4 = vector.broadcast %3 : vector<128x1xf32> to vector<128x8xf32>
    %5 = arith.addf %2, %4 : vector<128x8xf32>
    %cst_5 = arith.constant 0.000000e+00 : f32
    %6 = vector.broadcast %cst_5 : f32 to vector<128x8xf32>
    %7 = arith.maximumf %5, %6 : vector<128x8xf32>
    %c0_6 = arith.constant 0 : index
    %c0_7 = arith.constant 0 : index
    %8 = vector.load %arg4[%c0_6, %c0_7] : memref<2x128xf32, #tpu.memory_space<vmem>>, vector<2x128xf32>
    %cst_8 = arith.constant dense<0.000000e+00> : vector<2x8xf32>
    %9 = tpu.matmul %8, %7, %cst_8 {dimension_numbers = #tpu.dot_dimension_numbers<[1], [0], [0], [1], [0, 0, 1, 1], [], []>} : vector<2x128xf32>, vector<128x8xf32>, vector<2x8xf32> -> vector<2x8xf32>
    %c0_9 = arith.constant 0 : index
    %c0_10 = arith.constant 0 : index
    %10 = vector.load %arg5[%c0_9, %c0_10] : memref<2x1xf32, #tpu.memory_space<vmem>>, vector<2x1xf32>
    %11 = vector.broadcast %10 : vector<2x1xf32> to vector<2x8xf32>
    %12 = arith.addf %9, %11 : vector<2x8xf32>
    %c0_11 = arith.constant 0 : index
    %c0_12 = arith.constant 0 : index
    %13 = vector.load %arg6[%c0_11, %c0_12] : memref<2x8xf32, #tpu.memory_space<vmem>>, vector<2x8xf32>
    tpu.vector_store %arg6[%c0_11, %c0_12], %12 {strides = array<i32>} : memref<2x8xf32, #tpu.memory_space<vmem>>, vector<2x8xf32>,
    return
  }
  func.func @transform_0(%arg0: i32) -> (i32, i32) {
    %c0_i32 = arith.constant 0 : i32
    %c0_i32_0 = arith.constant 0 : i32
    return %c0_i32, %arg0 : i32, i32
  }
  func.func @transform_1(%arg0: i32) -> (i32, i32) {
    %c0_i32 = arith.constant 0 : i32
    %c0_i32_0 = arith.constant 0 : i32
    %c0_i32_1 = arith.constant 0 : i32
    return %c0_i32, %c0_i32_0 : i32, i32
  }
  func.func @transform_2(%arg0: i32) -> (i32, i32) {
    %c0_i32 = arith.constant 0 : i32
    %c0_i32_0 = arith.constant 0 : i32
    %c0_i32_1 = arith.constant 0 : i32
    return %c0_i32, %c0_i32_0 : i32, i32
  }
  func.func @transform_3(%arg0: i32) -> (i32, i32) {
    %c0_i32 = arith.constant 0 : i32
    %c0_i32_0 = arith.constant 0 : i32
    %c0_i32_1 = arith.constant 0 : i32
    return %c0_i32, %c0_i32_0 : i32, i32
  }
  func.func @transform_4(%arg0: i32) -> (i32, i32) {
    %c0_i32 = arith.constant 0 : i32
    %c0_i32_0 = arith.constant 0 : i32
    %c0_i32_1 = arith.constant 0 : i32
    return %c0_i32, %c0_i32_0 : i32, i32
  }
  func.func @transform_5(%arg0: i32) -> (i32, i32) {
    %c0_i32 = arith.constant 0 : i32
    %c0_i32_0 = arith.constant 0 : i32
    return %c0_i32, %arg0 : i32, i32
  }
}

</mosaic_0001>

<bundles_post_ra>
// kernel: net_forward.1
= control target key start
LH: loop header
LB: loop body
LE: loop exit
PB: predicated region body
PF: predicated region fallthrough
CT: control target
= control target key end

     0   :  { %vm183_vm0 = vcmask 1043456   ;;  %vm134_vm1 = vcmask 31744   ;;  %v581_v4 = vmov 0   ;;  %s768_s0 = inlined_call_operand.vmem [shape: f32[4,8], index: 0, kind: input, shape index: {}]   ;;  %s769_s1 = inlined_call_operand.vmem [shape: f32[128,4], index: 1, kind: input, shape index: {}]   ;;  %s770_s2 = inlined_call_operand.vmem [shape: f32[128,1], index: 2, kind: input, shape index: {}]   ;;  %s771_s3 = inlined_call_operand.vmem [shape: f32[2,128], index: 3, kind: input, shape index: {}]   ;;  %s772_s4 = inlined_call_operand.vmem [shape: f32[2,1], index: 4, kind: input, shape index: {}]   ;;  %s773_s5 = inlined_call_operand.hbm [shape: f32[2,8], index: 5, kind: output, shape index: {}]  }
   0x1   :  { %v21_v0 = vld [vmem:[%s768_s0] sm:$0xf]  ;;  %v23_v2 = vld [vmem:[%s769_s1 + $0x8] sm:$0xff]  ;;  %v24_v3 = vld [vmem:[%s769_s1 + $0x10] sm:$0xff]  ;;  %557 = vset.pattern.permute.xlu0 %v581_v4  ;;  %558 = vset.pattern.permute.xlu1 %v581_v4 }
   0x2   :  { %v22_v1 = vld [vmem:[%s769_s1] sm:$0xff]  ;;  %492 = vmatprep.subr.msk.mxu0 %vm183_vm0, %v21_v0  ;;  %v25_v5 = vld [vmem:[%s769_s1 + $0x18] sm:$0xff]  ;;  %v51_v8 = vld [vmem:[%s770_s2 + $0x68] sm:$0xff] }
   0x3   :  { %494 = vmatprep.mubr.msk.f32.mxu0 %vm134_vm1, %v22_v1  ;;  %493 = vmatpush3.msk.msra.mxu0 %vm183_vm0, %v21_v0  ;;  %v26_v6 = vld [vmem:[%s769_s1 + $0x20] sm:$0xff]  ;;  %v53_v7 = vld [vmem:[%s770_s2 + $0x78] sm:$0xff]  ;;  %v52_v9 = vld [vmem:[%s770_s2 + $0x70] sm:$0xff] }
   0x4   :  { %495 = vmatmul.mubr.msk.f32.vlgmr.msra.gmra.mxu0 %vm134_vm1, %v23_v2  ;;  %131 = vperm.xlu0 %557, %v53_v7   ;;  %v27_v10 = vld [vmem:[%s769_s1 + $0x28] sm:$0xff]  ;;  %v50_v11 = vld [vmem:[%s770_s2 + $0x60] sm:$0xff]  ;;  %v28_v12 = vld [vmem:[%s769_s1 + $0x30] sm:$0xff] }
   0x5   :  { %497 = vmatprep.mubr.msk.f32.mxu0 %vm134_vm1, %v24_v3  ;;  %121 = vperm.xlu1 %558, %v51_v8   ;;  %v49_v13 = vld [vmem:[%s770_s2 + $0x58] sm:$0xff] }
   0x8   :  { %498 = vmatmul.mubr.msk.f32.gmra.mxu0 %vm134_vm1, %v25_v5  ;;  %126 = vperm.xlu0 %557, %v52_v9  }
   0x9   :  { %500 = vmatprep.mubr.msk.f32.mxu0 %vm134_vm1, %v26_v6  ;;  %116 = vperm.xlu1 %558, %v50_v11  }
   0xc   :  { %501 = vmatmul.mubr.msk.f32.gmra.mxu0 %vm134_vm1, %v27_v10 }
   0xd   :  { %10 = vsyncpa [#allocation3], 0  ;;  %503 = vmatprep.mubr.msk.f32.mxu0 %vm134_vm1, %v28_v12  ;;  %v29_v14 = vld [vmem:[%s769_s1 + $0x38] sm:$0xff]  ;;  %v48_v15 = vld [vmem:[%s770_s2 + $0x50] sm:$0xff]  ;;  %111 = vperm.xlu0 %557, %v49_v13   ;;  %v582_v35 = vmov 0.0   ;;  %vm583_vm2 = vmmov 0  }
   0xe   :  { %v30_v16 = vld [vmem:[%s769_s1 + $0x40] sm:$0xff]  ;;  %106 = vperm.xlu1 %558, %v48_v15   ;;  %v47_v17 = vld [vmem:[%s770_s2 + $0x48] sm:$0xff]  ;;  %v32_v20 = vld [vmem:[%s769_s1 + $0x50] sm:$0xff]  ;;  %518 = vmatprep.subr.mxu1 %v582_v35  ;;  %s584_s7 = smov [#allocation2]   ;;  %vm425_vm3 = vcmask 58368  }
   0xf   :  { %v31_v18 = vld [vmem:[%s769_s1 + $0x48] sm:$0xff]  ;;  %v46_v19 = vld [vmem:[%s770_s2 + $0x40] sm:$0xff]  ;;  %v45_v21 = vld [vmem:[%s770_s2 + $0x38] sm:$0xff]  ;;  %550 = vmatprep.mubr.msk.f32.mxu1 %vm583_vm2, %v582_v35  ;;  %s433_s8 = sshll.u32 %s584_s7, 4  ;;  %s434_s8 = int_to_ptr.vmem [resolvable:$true] %s433_s8 }
  0x10   :  { %504 = vmatmul.mubr.msk.f32.gmra.mxu0 %vm134_vm1, %v29_v14  ;;  %v33_v22 = vld [vmem:[%s769_s1 + $0x58] sm:$0xff]  ;;  %v44_v23 = vld [vmem:[%s770_s2 + $0x30] sm:$0xff]  ;;  %v34_v24 = vld [vmem:[%s769_s1 + $0x60] sm:$0xff]  ;;  %s559_s9 = scalar_lea.vmem %s434_s8, 32  ;;  %p564_p1 = scmp.lt.s32.totalorder %s434_s8, %s434_s8 }
  0x11   :  { %506 = vmatprep.mubr.msk.f32.mxu0 %vm134_vm1, %v30_v16  ;;  %101 = vperm.xlu0 %557, %v47_v17   ;;  %v43_v25 = vld [vmem:[%s770_s2 + $0x28] sm:$0xff]  ;;  %v42_v27 = vld [vmem:[%s770_s2 + $0x20] sm:$0xff]  ;;  %v36_v28 = vld [vmem:[%s769_s1 + $0x70] sm:$0xff]  ;;  %p560_p0 = scmp.ne.s32.totalorder %s434_s8, %s559_s9  ;;  %p565_p2 = scmp.lt.s32.totalorder %s559_s9, %s559_s9 }
  0x12   :  { %96 = vperm.xlu1 %558, %v46_v19   ;;  %v35_v26 = vld [vmem:[%s769_s1 + $0x68] sm:$0xff]  ;;  %v41_v29 = vld [vmem:[%s770_s2 + $0x18] sm:$0xff]  ;;  %v40_v31 = vld [vmem:[%s770_s2 + $0x10] sm:$0xff] }
  0x13   :  { %v37_v30 = vld [vmem:[%s769_s1 + $0x78] sm:$0xff]  ;;  %v39_v32 = vld [vmem:[%s770_s2 + $0x8] sm:$0xff]  ;;  %v38_v33 = vld [vmem:[%s770_s2] sm:$0xff]  ;;  %p566_p3 = por %p565_p2, %p564_p1 }
  0x14   :  { %507 = vmatmul.mubr.msk.f32.gmra.mxu0 %vm134_vm1, %v31_v18  ;;  %v349_v34 = vld [vmem:[%s772_s4] sm:$0x3] }
  0x15   :  { %509 = vmatprep.mubr.msk.f32.mxu0 %vm134_vm1, %v32_v20  ;;  %91 = vperm.xlu0 %557, %v45_v21   ;;  %p567_p4 = pnand %p566_p3, %p560_p0 }
  0x16   :  { %86 = vperm.xlu1 %558, %v44_v23  }
  0x18   :  { %510 = vmatmul.mubr.msk.f32.gmra.mxu0 %vm134_vm1, %v33_v22 }
  0x19   :  { %512 = vmatprep.mubr.msk.f32.mxu0 %vm134_vm1, %v34_v24  ;;  %81 = vperm.xlu0 %557, %v43_v25  }
  0x1a   :  { %76 = vperm.xlu1 %558, %v42_v27  }
  0x1c   :  { %513 = vmatmul.mubr.msk.f32.gmra.mxu0 %vm134_vm1, %v35_v26 }
  0x1d   :  { %515 = vmatprep.mubr.msk.f32.mxu0 %vm134_vm1, %v36_v28  ;;  %71 = vperm.xlu0 %557, %v41_v29  }
  0x1e   :  { %66 = vperm.xlu1 %558, %v40_v31  }
  0x20   :  { %516 = vmatmul.mubr.msk.f32.gmra.mxu0 %vm134_vm1, %v37_v30 }
  0x21   :  { %61 = vperm.xlu0 %557, %v39_v32  }
  0x22   :  { %56 = vperm.xlu1 %558, %v38_v33  }
  0x25   :  { %352 = vperm.xlu0 %557, %v349_v34  }
  0x7f   :  { %v132_v41 = vpop.permute.xlu0 %131 }
  0x80   :  { %v122_v43 = vpop.permute.xlu1 %121 }
  0x83   :  { %v127_v46 = vpop.permute.xlu0 %126 }
  0x84   :  { %v117_v48 = vpop.permute.xlu1 %116 }
  0x88   :  { %v112_v51 = vpop.permute.xlu0 %111 }
  0x89   :  { %v107_v53 = vpop.permute.xlu1 %106 }
  0x8c   :  { %v102_v56 = vpop.permute.xlu0 %101 }
  0x8d   :  { %v97_v59 = vpop.permute.xlu1 %96 }
  0x90   :  { %v92_v2 = vpop.permute.xlu0 %91 }
  0x91   :  { %v87_v5 = vpop.permute.xlu1 %86 }
  0x94   :  { %v82_v10 = vpop.permute.xlu0 %81 }
  0x95   :  { %v77_v13 = vpop.permute.xlu1 %76 }
  0x98   :  { %v72_v18 = vpop.permute.xlu0 %71 }
  0x99   :  { %v67_v21 = vpop.permute.xlu1 %66 }
  0x9c   :  { %v62_v26 = vpop.permute.xlu0 %61 }
  0x9d   :  { %v57_v29 = vpop.permute.xlu1 %56 }
  0xc4   :  { %v735_v36 = vpop.f32.mrf.mxu0 }
  0xc5   :  { %v259_v30 = vadd.f32 %v735_v36, %v62_v26  ;;  %v348_v36 = vld [vmem:[%s771_s3] sm:$0x3] }
  0xc6   :  { %v737_v37 = vpop.f32.mrf.mxu0 }
  0xc7   :  { %v254_v32 = vadd.f32 %v737_v37, %v57_v29  ;;  %v333_v34 = vmax.f32 %v259_v30, 0.0  ;;  %v353_v37 = vpop.permute.xlu0 %352 }
  0xc8   :  { %v739_v38 = vpop.f32.mrf.mxu0 }
  0xc9   :  { %v269_v24 = vadd.f32 %v739_v38, %v72_v18  ;;  %v332_v38 = vmax.f32 %v254_v32, 0.0 }
  0xca   :  { %v741_v39 = vpop.f32.mrf.mxu0 }
  0xcb   :  { %v264_v27 = vadd.f32 %v741_v39, %v67_v21  ;;  %v335_v31 = vmax.f32 %v269_v24, 0.0 }
  0xcc   :  { %v502_v40 = vpop.f32.mrf.mxu0 }
  0xcd   :  { %v279_v19 = vadd.f32 %v502_v40, %v82_v10  ;;  %v334_v33 = vmax.f32 %v264_v27, 0.0 }
  0xce   :  { %v273_v42 = vpop.f32.mrf.mxu0 }
  0xcf   :  { %v274_v22 = vadd.f32 %v273_v42, %v77_v13  ;;  %v337_v25 = vmax.f32 %v279_v19, 0.0 }
  0xd0   :  { %v505_v44 = vpop.f32.mrf.mxu0 }
  0xd1   :  { %v289_v14 = vadd.f32 %v505_v44, %v92_v2  ;;  %v336_v28 = vmax.f32 %v274_v22, 0.0 }
  0xd2   :  { %v283_v45 = vpop.f32.mrf.mxu0 }
  0xd3   :  { %v284_v16 = vadd.f32 %v283_v45, %v87_v5  ;;  %v339_v20 = vmax.f32 %v289_v14, 0.0 }
  0xd4   :  { %v508_v47 = vpop.f32.mrf.mxu0 }
  0xd5   :  { %v299_v8 = vadd.f32 %v508_v47, %v102_v56  ;;  %v338_v23 = vmax.f32 %v284_v16, 0.0 }
  0xd6   :  { %v293_v49 = vpop.f32.mrf.mxu0 }
  0xd7   :  { %v294_v11 = vadd.f32 %v293_v49, %v97_v59  ;;  %v341_v15 = vmax.f32 %v299_v8, 0.0 }
  0xd8   :  { %v511_v50 = vpop.f32.mrf.mxu0 }
  0xd9   :  { %v309_v3 = vadd.f32 %v511_v50, %v112_v51  ;;  %v340_v17 = vmax.f32 %v294_v11, 0.0 }
  0xda   :  { %v303_v52 = vpop.f32.mrf.mxu0 }
  0xdb   :  { %v304_v6 = vadd.f32 %v303_v52, %v107_v53  ;;  %v343_v9 = vmax.f32 %v309_v3, 0.0 }
  0xdc   :  { %v514_v54 = vpop.f32.mrf.mxu0 }
  0xdd   :  { %v319_v61 = vadd.f32 %v514_v54, %v122_v43  ;;  %v342_v12 = vmax.f32 %v304_v6, 0.0 }
  0xde   :  { %v313_v55 = vpop.f32.mrf.mxu0 }
  0xdf   :  { %v314_v0 = vadd.f32 %v313_v55, %v117_v48  ;;  %v345_v4 = vmax.f32 %v319_v61, 0.0 }
  0xe0   :  { %v517_v57 = vpop.f32.mrf.mxu0 }
  0xe1   :  { %v329_v58 = vadd.f32 %v517_v57, %v132_v41  ;;  %v344_v7 = vmax.f32 %v314_v0, 0.0 }
  0xe2   :  { %v323_v60 = vpop.f32.mrf.mxu0 }
  0xe3   :  { %v347_v62 = vmax.f32 %v329_v58, 0.0  ;;  %v324_v63 = vadd.f32 %v323_v60, %v127_v46 }
  0xe5   :  { %v346_v1 = vmax.f32 %v324_v63, 0.0  ;;  %519 = vmatpush3.msra.mxu1 %v347_v62 }
  0xe6   :  { %520 = vmatprep.subr.mxu1 %v582_v35 }
  0xe7   :  { %521 = vmatpush3.msra.mxu1 %v346_v1 }
  0xe8   :  { %522 = vmatprep.subr.mxu1 %v582_v35 }
  0xe9   :  { %523 = vmatpush3.msra.mxu1 %v345_v4 }
  0xea   :  { %524 = vmatprep.subr.mxu1 %v582_v35 }
  0xeb   :  { %525 = vmatpush3.msra.mxu1 %v344_v7 }
  0xec   :  { %526 = vmatprep.subr.mxu1 %v582_v35 }
  0xed   :  { %527 = vmatpush3.msra.mxu1 %v343_v9 }
  0xee   :  { %528 = vmatprep.subr.mxu1 %v582_v35 }
  0xef   :  { %529 = vmatpush3.msra.mxu1 %v342_v12 }
  0xf0   :  { %530 = vmatprep.subr.mxu1 %v582_v35 }
  0xf1   :  { %531 = vmatpush3.msra.mxu1 %v341_v15 }
  0xf2   :  { %532 = vmatprep.subr.mxu1 %v582_v35 }
  0xf3   :  { %533 = vmatpush3.msra.mxu1 %v340_v17 }
  0xf4   :  { %534 = vmatprep.subr.mxu1 %v582_v35 }
  0xf5   :  { %535 = vmatpush3.msra.mxu1 %v339_v20 }
  0xf6   :  { %536 = vmatprep.subr.mxu1 %v582_v35 }
  0xf7   :  { %537 = vmatpush3.msra.mxu1 %v338_v23 }
  0xf8   :  { %538 = vmatprep.subr.mxu1 %v582_v35 }
  0xf9   :  { %539 = vmatpush3.msra.mxu1 %v337_v25 }
  0xfa   :  { %540 = vmatprep.subr.mxu1 %v582_v35 }
  0xfb   :  { %541 = vmatpush3.msra.mxu1 %v336_v28 }
  0xfc   :  { %542 = vmatprep.subr.mxu1 %v582_v35 }
  0xfd   :  { %543 = vmatpush3.msra.mxu1 %v335_v31 }
  0xfe   :  { %544 = vmatprep.subr.mxu1 %v582_v35 }
  0xff   :  { %545 = vmatpush3.msra.mxu1 %v334_v33 }
 0x100   :  { %546 = vmatprep.subr.mxu1 %v582_v35 }
 0x101   :  { %547 = vmatpush3.msra.mxu1 %v333_v34 }
 0x102   :  { %548 = vmatprep.subr.mxu1 %v582_v35 }
 0x103   :  { %549 = vmatpush3.msra.mxu1 %v332_v38 }
 0x104   :  { %551 = vmatmul.mubr.f32.vlgmr.msra.gmra.mxu1 %v348_v36 }
 0x1c4   :  { %v421_v39 = vpop.f32.mrf.mxu1 }
 0x1c5   :  { %v422_v40 = vadd.f32 %v421_v39, %v353_v37 }
 0x1c6   :  { %v552_v41 = vpop.f32.mrf.mxu1 }
 0x1c7   :  { %426 = vst.msk [vmem:[#allocation2] sm:$0x3] %vm425_vm3, %v422_v40 }
 0x1c8   :  { %570 = shalt.err (!%p567_p4)
}
 0x1c9   :  { %436 = dma.vmem_to_hbm [thread:$0]  %s434_s8, 32, %s773_s5, [#allocation3]  }
 0x1ca   :  { %579 = dma.done.wait [#allocation3], 32  }
 0x1cb   :  { %580 = vsyncadd [#allocation3], 4294967264 }
 0x1cc   :  { %440 = vsyncpa [#allocation3], 1 }

</bundles_post_ra>
